<compile_context>
chip_gen: v6e
topology: v6e:2x2x1
jax: 0.10.0
libtpu: 0.0.40
codegen_flags: <defaults>
</compile_context>

<pallas_src>
import functools
import math

import jax
import jax.numpy as jnp
import numpy as np
from jax import lax
from jax.experimental import pallas as pl
from jax.experimental.pallas import tpu as pltpu


def mha_kernel(xq_ref, xk_ref, xv_ref, w_ref, out_ref, *,
               n_heads, d_k, d_v, lk, h_dim):
    bb = xq_ref.shape[0]              # batch rows in this block (Lq == 1)
    dq = n_heads * d_k
    dvt = n_heads * d_v
    qkv_cols = 2 * dq + dvt

    xq = xq_ref[...]                                           # (bb, H) residual / query

    # ---- fused Q/K/V projection: one MXU matmul instead of seven ----
    rows = [xq] + [xk_ref[j] for j in range(lk)] + [xv_ref[j] for j in range(lk)]
    x_all = jnp.concatenate(rows, axis=0)                      # ((1+2*lk)*bb, H)
    w_qkv = w_ref[0:h_dim, 0:qkv_cols]                         # [Wq/sqrt(dk) | Wk | Wv]
    proj = jnp.dot(x_all, w_qkv, preferred_element_type=jnp.float32)

    q = proj[0:bb, 0:dq]                                       # (bb, dq)  (scale folded in)
    ks = [proj[(1 + j) * bb:(2 + j) * bb, dq:2 * dq] for j in range(lk)]
    vs = [proj[(1 + lk + j) * bb:(2 + lk + j) * bb, 2 * dq:qkv_cols] for j in range(lk)]

    # ---- head-vectorized scores: segmented lane-sum via one 0/1 matmul ----
    col = lax.broadcasted_iota(jnp.int32, (dq, n_heads), 0)
    lo = lax.broadcasted_iota(jnp.int32, (dq, n_heads), 1) * d_k
    s_dk = ((col >= lo) & (col < lo + d_k)).astype(jnp.float32)          # (dq, nh)

    qk = jnp.concatenate([q * k for k in ks], axis=0)          # (lk*bb, dq)
    s_all = jnp.dot(qk, s_dk, preferred_element_type=jnp.float32)        # (lk*bb, nh)
    s = [s_all[j * bb:(j + 1) * bb, :] for j in range(lk)]     # lk x (bb, nh)

    # ---- softmax over the lk keys: purely elementwise 2-D math ----
    m = s[0]
    for j in range(1, lk):
        m = jnp.maximum(m, s[j])
    e = [jnp.exp(sj - m) for sj in s]
    denom = e[0]
    for j in range(1, lk):
        denom = denom + e[j]
    inv = 1.0 / denom                                          # exact (tolerance vs ref)
    attn = [ej * inv for ej in e]                              # lk x (bb, nh)

    # ---- expand per-head weights over d_v value lanes: one 0/1 matmul ----
    colv = lax.broadcasted_iota(jnp.int32, (n_heads, dvt), 1)
    lov = lax.broadcasted_iota(jnp.int32, (n_heads, dvt), 0) * d_v
    s_dv = ((colv >= lov) & (colv < lov + d_v)).astype(jnp.float32)      # (nh, dvt)

    a_all = jnp.concatenate(attn, axis=0)                      # (lk*bb, nh)
    aw_all = jnp.dot(a_all, s_dv, preferred_element_type=jnp.float32)    # (lk*bb, dvt)

    ctx = aw_all[0:bb, :] * vs[0]
    for j in range(1, lk):
        ctx = ctx + aw_all[j * bb:(j + 1) * bb, :] * vs[j]     # (bb, dvt)

    # ---- output projection + residual + LayerNorm(gamma=1, beta=0, eps=1e-5) ----
    w_fc = w_ref[0:dvt, qkv_cols:qkv_cols + h_dim]             # (dvt, H)
    out = jnp.dot(ctx, w_fc, preferred_element_type=jnp.float32) + xq

    mean = jnp.mean(out, axis=-1, keepdims=True)
    var = jnp.mean((out - mean) ** 2, axis=-1, keepdims=True)
    out_ref[...] = ((out - mean) * lax.rsqrt(var + 1e-5)).astype(out_ref.dtype)


def pack_mha_weights(w_q, w_k, w_v, w_fc, *, d_k):
    """One-time parameter prep: fold 1/sqrt(d_k) into W_Q and pack
    [Wq' | Wk | Wv | Wfc] into a single array so the kernel takes one weight ref."""
    h_dim = w_q.shape[0]
    dv_in = w_fc.shape[0]                        # n_heads * d_v
    rows = max(h_dim, dv_in)

    def pad_rows(w):
        return jnp.pad(w, ((0, rows - w.shape[0]), (0, 0)))

    return jnp.concatenate(
        [pad_rows(w_q / math.sqrt(d_k)), pad_rows(w_k), pad_rows(w_v), pad_rows(w_fc)],
        axis=1)


def multi_head_attention(input_Q, input_K, input_V, w_packed, *,
                         n_heads, d_k, d_v, block_b=None):
    B, Lq, h_dim = input_Q.shape
    assert Lq == 1, "module spec: input_Q is (batch, 1, h_dim)"
    _, Lk, _ = input_K.shape
    assert input_V.shape == input_K.shape

    # TODO(synk): for big batches feed them all at once — the batch grid below
    # amortizes launch/DMA overhead and shards across both v7x TensorCores.
    if block_b is None:
        block_b = B if B <= 8 else 8
    assert B % block_b == 0

    # HBM-side layout prep (tiny): queries as a 2-D slab, K/V key-major so the
    # kernel only needs leading-axis integer indexing (no in-kernel reshapes).
    xq2 = input_Q.reshape(B, h_dim)                    # (B, H)
    xk3 = jnp.transpose(input_K, (1, 0, 2))            # (Lk, B, H)
    xv3 = jnp.transpose(input_V, (1, 0, 2))            # (Lk, B, H)

    wrows, wcols = w_packed.shape
    kernel = functools.partial(mha_kernel, n_heads=n_heads, d_k=d_k, d_v=d_v,
                               lk=Lk, h_dim=h_dim)

    out2 = pl.pallas_call(
        kernel,
        out_shape=jax.ShapeDtypeStruct((B, h_dim), jnp.float32),
        grid=(B // block_b,),
        in_specs=[
            pl.BlockSpec((block_b, h_dim), lambda i: (i, 0)),
            pl.BlockSpec((Lk, block_b, h_dim), lambda i: (0, i, 0)),
            pl.BlockSpec((Lk, block_b, h_dim), lambda i: (0, i, 0)),
            pl.BlockSpec((wrows, wcols), lambda i: (0, 0)),    # weights stay resident
        ],
        out_specs=pl.BlockSpec((block_b, h_dim), lambda i: (i, 0)),
        compiler_params=pltpu.CompilerParams(
            dimension_semantics=("parallel",)),
    )(xq2, xk3, xv3, w_packed)
    return out2.reshape(B, Lq, h_dim)


def reference(input_Q, input_K, input_V, w_q, w_k, w_v, w_fc, *, n_heads, d_k, d_v):
    """Pure-JAX replica of the PyTorch forward (unpacked weights) for verification."""
    B = input_Q.shape[0]
    hp = jax.lax.Precision.HIGHEST
    Q = jnp.matmul(input_Q, w_q, precision=hp).reshape(B, -1, n_heads, d_k).transpose(0, 2, 1, 3)
    K = jnp.matmul(input_K, w_k, precision=hp).reshape(B, -1, n_heads, d_k).transpose(0, 2, 1, 3)
    V = jnp.matmul(input_V, w_v, precision=hp).reshape(B, -1, n_heads, d_v).transpose(0, 2, 1, 3)
    scores = jnp.einsum('bhqd,bhkd->bhqk', Q, K, precision=hp) / math.sqrt(d_k)
    attn = jax.nn.softmax(scores, axis=-1)
    ctx = jnp.einsum('bhqk,bhkd->bhqd', attn, V, precision=hp)
    ctx = ctx.transpose(0, 2, 1, 3).reshape(B, -1, n_heads * d_v)
    out = jnp.matmul(ctx, w_fc, precision=hp) + input_Q
    mean = out.mean(-1, keepdims=True)
    var = ((out - mean) ** 2).mean(-1, keepdims=True)
    return (out - mean) / jnp.sqrt(var + 1e-5)


if __name__ == "__main__":
    # Shapes implied by the module: Lq=1, Lkv=3.
    B, h_dim, d_k, d_v, n_heads = 2, 32, 8, 8, 4

    key = jax.random.PRNGKey(0)
    kq, kk, kv, kwq, kwk, kwv, kwf = jax.random.split(key, 7)

    input_Q = jax.random.normal(kq, (B, 1, h_dim), jnp.float32)
    input_K = jax.random.normal(kk, (B, 3, h_dim), jnp.float32)
    input_V = jax.random.normal(kv, (B, 3, h_dim), jnp.float32)

    def linear_weight(k, fan_in, fan_out):
        # deterministic init, stored (in, out) so y = x @ W
        bound = 1.0 / math.sqrt(fan_in)
        return jax.random.uniform(k, (fan_in, fan_out), jnp.float32, -bound, bound)

    w_q = linear_weight(kwq, h_dim, d_k * n_heads)
    w_k = linear_weight(kwk, h_dim, d_k * n_heads)
    w_v = linear_weight(kwv, h_dim, d_v * n_heads)
    w_fc = linear_weight(kwf, n_heads * d_v, h_dim)

    # One-time parameter prep: fold the score scale into W_Q and pack weights.
    w_packed = pack_mha_weights(w_q, w_k, w_v, w_fc, d_k=d_k)

    out = multi_head_attention(input_Q, input_K, input_V, w_packed,
                               n_heads=n_heads, d_k=d_k, d_v=d_v)
    out = jax.block_until_ready(out)

    ref = reference(input_Q, input_K, input_V, w_q, w_k, w_v, w_fc,
                    n_heads=n_heads, d_k=d_k, d_v=d_v)
    np.testing.assert_allclose(np.asarray(out), np.asarray(ref), rtol=1e-4, atol=1e-4)

    print("KERNEL_OK")
</pallas_src>

<mosaic_0001>
module attributes {stable_mosaic.version = 11 : i64} {
  func.func @mha_kernel(%arg0: i32, %arg1: memref<2x32xf32, #tpu.memory_space<vmem>>, %arg2: memref<3x2x32xf32, #tpu.memory_space<vmem>>, %arg3: memref<3x2x32xf32, #tpu.memory_space<vmem>>, %arg4: memref<32x128xf32, #tpu.memory_space<vmem>>, %arg5: memref<2x32xf32, #tpu.memory_space<vmem>>) attributes {dimension_semantics = [#tpu.dimension_semantics<parallel>], iteration_bounds = array<i64: 1>, scalar_prefetch = 0 : i64, scratch_operands = 0 : i64, tpu.core_type = #tpu.core_type<tc>, window_params = [{transform_indices = @transform_0, window_bounds = array<i64: 2, 32>}, {transform_indices = @transform_1, window_bounds = array<i64: 3, 2, 32>}, {transform_indices = @transform_2, window_bounds = array<i64: 3, 2, 32>}, {pipeline_mode = #tpu.pipeline_mode<synchronous>, transform_indices = @transform_3, window_bounds = array<i64: 32, 128>}, {transform_indices = @transform_4, window_bounds = array<i64: 2, 32>}]} {
    %c0 = arith.constant 0 : index
    %c0_0 = arith.constant 0 : index
    %0 = vector.load %arg1[%c0, %c0_0] : memref<2x32xf32, #tpu.memory_space<vmem>>, vector<2x32xf32>
    %c0_1 = arith.constant 0 : index
    %c0_2 = arith.constant 0 : index
    %c0_3 = arith.constant 0 : index
    %1 = vector.load %arg2[%c0_1, %c0_2, %c0_3] : memref<3x2x32xf32, #tpu.memory_space<vmem>>, vector<1x2x32xf32>
    %2 = vector.shape_cast %1 : vector<1x2x32xf32> to vector<2x32xf32>
    %c1 = arith.constant 1 : index
    %c0_4 = arith.constant 0 : index
    %c0_5 = arith.constant 0 : index
    %3 = vector.load %arg2[%c1, %c0_4, %c0_5] : memref<3x2x32xf32, #tpu.memory_space<vmem>>, vector<1x2x32xf32>
    %4 = vector.shape_cast %3 : vector<1x2x32xf32> to vector<2x32xf32>
    %c2 = arith.constant 2 : index
    %c0_6 = arith.constant 0 : index
    %c0_7 = arith.constant 0 : index
    %5 = vector.load %arg2[%c2, %c0_6, %c0_7] : memref<3x2x32xf32, #tpu.memory_space<vmem>>, vector<1x2x32xf32>
    %6 = vector.shape_cast %5 : vector<1x2x32xf32> to vector<2x32xf32>
    %c0_8 = arith.constant 0 : index
    %c0_9 = arith.constant 0 : index
    %c0_10 = arith.constant 0 : index
    %7 = vector.load %arg3[%c0_8, %c0_9, %c0_10] : memref<3x2x32xf32, #tpu.memory_space<vmem>>, vector<1x2x32xf32>
    %8 = vector.shape_cast %7 : vector<1x2x32xf32> to vector<2x32xf32>
    %c1_11 = arith.constant 1 : index
    %c0_12 = arith.constant 0 : index
    %c0_13 = arith.constant 0 : index
    %9 = vector.load %arg3[%c1_11, %c0_12, %c0_13] : memref<3x2x32xf32, #tpu.memory_space<vmem>>, vector<1x2x32xf32>
    %10 = vector.shape_cast %9 : vector<1x2x32xf32> to vector<2x32xf32>
    %c2_14 = arith.constant 2 : index
    %c0_15 = arith.constant 0 : index
    %c0_16 = arith.constant 0 : index
    %11 = vector.load %arg3[%c2_14, %c0_15, %c0_16] : memref<3x2x32xf32, #tpu.memory_space<vmem>>, vector<1x2x32xf32>
    %12 = vector.shape_cast %11 : vector<1x2x32xf32> to vector<2x32xf32>
    %13 = tpu.concatenate %0, %2, %4, %6, %8, %10, %12 in 0 : vector<2x32xf32>, vector<2x32xf32>, vector<2x32xf32>, vector<2x32xf32>, vector<2x32xf32>, vector<2x32xf32>, vector<2x32xf32> -> vector<14x32xf32>
    %c0_17 = arith.constant 0 : index
    %c0_18 = arith.constant 0 : index
    %14 = vector.load %arg4[%c0_17, %c0_18] : memref<32x128xf32, #tpu.memory_space<vmem>>, vector<32x96xf32>
    %cst = arith.constant dense<0.000000e+00> : vector<14x96xf32>
    %15 = tpu.matmul %13, %14, %cst {dimension_numbers = #tpu.dot_dimension_numbers<[1], [0], [0], [1], [0, 0, 1, 1], [], []>} : vector<14x32xf32>, vector<32x96xf32>, vector<14x96xf32> -> vector<14x96xf32>
    %16 = vector.extract_strided_slice %15 {offsets = [0, 0], sizes = [2, 32], strides = [1, 1]} : vector<14x96xf32> to vector<2x32xf32>
    %17 = vector.extract_strided_slice %15 {offsets = [2, 32], sizes = [2, 32], strides = [1, 1]} : vector<14x96xf32> to vector<2x32xf32>
    %18 = vector.extract_strided_slice %15 {offsets = [4, 32], sizes = [2, 32], strides = [1, 1]} : vector<14x96xf32> to vector<2x32xf32>
    %19 = vector.extract_strided_slice %15 {offsets = [6, 32], sizes = [2, 32], strides = [1, 1]} : vector<14x96xf32> to vector<2x32xf32>
    %20 = vector.extract_strided_slice %15 {offsets = [8, 64], sizes = [2, 32], strides = [1, 1]} : vector<14x96xf32> to vector<2x32xf32>
    %21 = vector.extract_strided_slice %15 {offsets = [10, 64], sizes = [2, 32], strides = [1, 1]} : vector<14x96xf32> to vector<2x32xf32>
    %22 = vector.extract_strided_slice %15 {offsets = [12, 64], sizes = [2, 32], strides = [1, 1]} : vector<14x96xf32> to vector<2x32xf32>
    %23 = tpu.iota {dimensions = array<i32: 0>} : vector<32x4xi32>
    %24 = tpu.iota {dimensions = array<i32: 1>} : vector<32x4xi32>
    %c8_i32 = arith.constant 8 : i32
    %25 = vector.broadcast %c8_i32 : i32 to vector<32x4xi32>
    %26 = arith.muli %24, %25 : vector<32x4xi32>
    %27 = arith.cmpi sge, %23, %26 : vector<32x4xi32>
    %c8_i32_19 = arith.constant 8 : i32
    %28 = vector.broadcast %c8_i32_19 : i32 to vector<32x4xi32>
    %29 = arith.addi %26, %28 : vector<32x4xi32>
    %30 = arith.cmpi slt, %23, %29 : vector<32x4xi32>
    %31 = arith.andi %27, %30 : vector<32x4xi1>
    %32 = arith.extui %31 : vector<32x4xi1> to vector<32x4xi32>
    %33 = arith.sitofp %32 : vector<32x4xi32> to vector<32x4xf32>
    %34 = arith.mulf %16, %17 : vector<2x32xf32>
    %35 = arith.mulf %16, %18 : vector<2x32xf32>
    %36 = arith.mulf %16, %19 : vector<2x32xf32>
    %37 = tpu.concatenate %34, %35, %36 in 0 : vector<2x32xf32>, vector<2x32xf32>, vector<2x32xf32> -> vector<6x32xf32>
    %cst_20 = arith.constant dense<0.000000e+00> : vector<6x4xf32>
    %38 = tpu.matmul %37, %33, %cst_20 {dimension_numbers = #tpu.dot_dimension_numbers<[1], [0], [0], [1], [0, 0, 1, 1], [], []>} : vector<6x32xf32>, vector<32x4xf32>, vector<6x4xf32> -> vector<6x4xf32>
    %39 = vector.extract_strided_slice %38 {offsets = [0, 0], sizes = [2, 4], strides = [1, 1]} : vector<6x4xf32> to vector<2x4xf32>
    %40 = vector.extract_strided_slice %38 {offsets = [2, 0], sizes = [2, 4], strides = [1, 1]} : vector<6x4xf32> to vector<2x4xf32>
    %41 = vector.extract_strided_slice %38 {offsets = [4, 0], sizes = [2, 4], strides = [1, 1]} : vector<6x4xf32> to vector<2x4xf32>
    %42 = arith.maximumf %39, %40 : vector<2x4xf32>
    %43 = arith.maximumf %42, %41 : vector<2x4xf32>
    %44 = arith.subf %39, %43 : vector<2x4xf32>
    %45 = math.exp %44 : vector<2x4xf32>
    %46 = arith.subf %40, %43 : vector<2x4xf32>
    %47 = math.exp %46 : vector<2x4xf32>
    %48 = arith.subf %41, %43 : vector<2x4xf32>
    %49 = math.exp %48 : vector<2x4xf32>
    %50 = arith.addf %45, %47 : vector<2x4xf32>
    %51 = arith.addf %50, %49 : vector<2x4xf32>
    %cst_21 = arith.constant 1.000000e+00 : f32
    %52 = vector.broadcast %cst_21 : f32 to vector<2x4xf32>
    %53 = arith.divf %52, %51 : vector<2x4xf32>
    %54 = arith.mulf %45, %53 : vector<2x4xf32>
    %55 = arith.mulf %47, %53 : vector<2x4xf32>
    %56 = arith.mulf %49, %53 : vector<2x4xf32>
    %57 = tpu.iota {dimensions = array<i32: 1>} : vector<4x32xi32>
    %58 = tpu.iota {dimensions = array<i32: 0>} : vector<4x32xi32>
    %c8_i32_22 = arith.constant 8 : i32
    %59 = vector.broadcast %c8_i32_22 : i32 to vector<4x32xi32>
    %60 = arith.muli %58, %59 : vector<4x32xi32>
    %61 = arith.cmpi sge, %57, %60 : vector<4x32xi32>
    %c8_i32_23 = arith.constant 8 : i32
    %62 = vector.broadcast %c8_i32_23 : i32 to vector<4x32xi32>
    %63 = arith.addi %60, %62 : vector<4x32xi32>
    %64 = arith.cmpi slt, %57, %63 : vector<4x32xi32>
    %65 = arith.andi %61, %64 : vector<4x32xi1>
    %66 = arith.extui %65 : vector<4x32xi1> to vector<4x32xi32>
    %67 = arith.sitofp %66 : vector<4x32xi32> to vector<4x32xf32>
    %68 = tpu.concatenate %54, %55, %56 in 0 : vector<2x4xf32>, vector<2x4xf32>, vector<2x4xf32> -> vector<6x4xf32>
    %cst_24 = arith.constant dense<0.000000e+00> : vector<6x32xf32>
    %69 = tpu.matmul %68, %67, %cst_24 {dimension_numbers = #tpu.dot_dimension_numbers<[1], [0], [0], [1], [0, 0, 1, 1], [], []>} : vector<6x4xf32>, vector<4x32xf32>, vector<6x32xf32> -> vector<6x32xf32>
    %70 = vector.extract_strided_slice %69 {offsets = [0, 0], sizes = [2, 32], strides = [1, 1]} : vector<6x32xf32> to vector<2x32xf32>
    %71 = arith.mulf %70, %20 : vector<2x32xf32>
    %72 = vector.extract_strided_slice %69 {offsets = [2, 0], sizes = [2, 32], strides = [1, 1]} : vector<6x32xf32> to vector<2x32xf32>
    %73 = arith.mulf %72, %21 : vector<2x32xf32>
    %74 = arith.addf %71, %73 : vector<2x32xf32>
    %75 = vector.extract_strided_slice %69 {offsets = [4, 0], sizes = [2, 32], strides = [1, 1]} : vector<6x32xf32> to vector<2x32xf32>
    %76 = arith.mulf %75, %22 : vector<2x32xf32>
    %77 = arith.addf %74, %76 : vector<2x32xf32>
    %c0_25 = arith.constant 0 : index
    %c96 = arith.constant 96 : index
    %78 = vector.load %arg4[%c0_25, %c96] : memref<32x128xf32, #tpu.memory_space<vmem>>, vector<32x32xf32>
    %cst_26 = arith.constant dense<0.000000e+00> : vector<2x32xf32>
    %79 = tpu.matmul %77, %78, %cst_26 {dimension_numbers = #tpu.dot_dimension_numbers<[1], [0], [0], [1], [0, 0, 1, 1], [], []>} : vector<2x32xf32>, vector<32x32xf32>, vector<2x32xf32> -> vector<2x32xf32>
    %80 = arith.addf %79, %0 : vector<2x32xf32>
    %cst_27 = arith.constant dense<0.000000e+00> : vector<2xf32>
    %81 = vector.multi_reduction <add>, %80, %cst_27 [1] : vector<2x32xf32> to vector<2xf32>
    %82 = vector.shape_cast %81 : vector<2xf32> to vector<2x1xf32>
    %cst_28 = arith.constant 3.200000e+01 : f32
    %83 = vector.broadcast %cst_28 : f32 to vector<2x1xf32>
    %84 = arith.divf %82, %83 : vector<2x1xf32>
    %85 = vector.broadcast %84 : vector<2x1xf32> to vector<2x32xf32>
    %86 = arith.subf %80, %85 : vector<2x32xf32>
    %87 = arith.mulf %86, %86 : vector<2x32xf32>
    %cst_29 = arith.constant dense<0.000000e+00> : vector<2xf32>
    %88 = vector.multi_reduction <add>, %87, %cst_29 [1] : vector<2x32xf32> to vector<2xf32>
    %89 = vector.shape_cast %88 : vector<2xf32> to vector<2x1xf32>
    %cst_30 = arith.constant 3.200000e+01 : f32
    %90 = vector.broadcast %cst_30 : f32 to vector<2x1xf32>
    %91 = arith.divf %89, %90 : vector<2x1xf32>
    %92 = vector.broadcast %84 : vector<2x1xf32> to vector<2x32xf32>
    %93 = arith.subf %80, %92 : vector<2x32xf32>
    %cst_31 = arith.constant 9.99999974E-6 : f32
    %94 = vector.broadcast %cst_31 : f32 to vector<2x1xf32>
    %95 = arith.addf %91, %94 : vector<2x1xf32>
    %96 = math.rsqrt %95 : vector<2x1xf32>
    %97 = vector.broadcast %96 : vector<2x1xf32> to vector<2x32xf32>
    %98 = arith.mulf %93, %97 : vector<2x32xf32>
    %c0_32 = arith.constant 0 : index
    %c0_33 = arith.constant 0 : index
    %99 = vector.load %arg5[%c0_32, %c0_33] : memref<2x32xf32, #tpu.memory_space<vmem>>, vector<2x32xf32>
    tpu.vector_store %arg5[%c0_32, %c0_33], %98 {strides = array<i32>} : memref<2x32xf32, #tpu.memory_space<vmem>>, vector<2x32xf32>,
    return
  }
  func.func @transform_0(%arg0: i32) -> (i32, i32) {
    %c0_i32 = arith.constant 0 : i32
    %c0_i32_0 = arith.constant 0 : i32
    return %arg0, %c0_i32 : i32, i32
  }
  func.func @transform_1(%arg0: i32) -> (i32, i32, i32) {
    %c0_i32 = arith.constant 0 : i32
    %c0_i32_0 = arith.constant 0 : i32
    %c0_i32_1 = arith.constant 0 : i32
    return %c0_i32, %arg0, %c0_i32_0 : i32, i32, i32
  }
  func.func @transform_2(%arg0: i32) -> (i32, i32, i32) {
    %c0_i32 = arith.constant 0 : i32
    %c0_i32_0 = arith.constant 0 : i32
    %c0_i32_1 = arith.constant 0 : i32
    return %c0_i32, %arg0, %c0_i32_0 : i32, i32, i32
  }
  func.func @transform_3(%arg0: i32) -> (i32, i32) {
    %c0_i32 = arith.constant 0 : i32
    %c0_i32_0 = arith.constant 0 : i32
    %c0_i32_1 = arith.constant 0 : i32
    return %c0_i32, %c0_i32_0 : i32, i32
  }
  func.func @transform_4(%arg0: i32) -> (i32, i32) {
    %c0_i32 = arith.constant 0 : i32
    %c0_i32_0 = arith.constant 0 : i32
    return %arg0, %c0_i32 : i32, i32
  }
}

</mosaic_0001>

<bundles_post_ra>
// kernel: tpu_custom_call.1
= control target key start
LH: loop header
LB: loop body
LE: loop exit
PB: predicated region body
PF: predicated region fallthrough
CT: control target
= control target key end

     0   :  { %9 = vsyncpa [#allocation3], 0  ;;  %s903_s0 = inlined_call_operand.hbm [shape: f32[2,32], index: 0, kind: input, shape index: {}]   ;;  %s904_s1 = inlined_call_operand.hbm [shape: f32[3,2,32], index: 1, kind: input, shape index: {}]   ;;  %s905_s2 = inlined_call_operand.hbm [shape: f32[3,2,32], index: 2, kind: input, shape index: {}]   ;;  %s906_s3 = inlined_call_operand.hbm [shape: f32[32,128], index: 3, kind: input, shape index: {}]   ;;  %s907_s4 = inlined_call_operand.hbm [shape: f32[2,32], index: 4, kind: output, shape index: {}]  }
   0x1   :  { %10 = vsyncpa [#allocation6], 0 }
   0x2   :  { %11 = vsyncpa [#allocation9], 0 }
   0x3   :  { %12 = vsyncpa [#allocation4], 0  ;;  %s779_s15 = smov [#allocation5]  }
   0x4   :  { %s28_s16 = sshll.u32 %s779_s15, 4  ;;  %s29_s16 = int_to_ptr.vmem [resolvable:$true] %s28_s16 }
   0x5   :  { %s679_s17 = scalar_lea.vmem %s29_s16, 96  ;;  %p684_p1 = scmp.lt.s32.totalorder %s29_s16, %s29_s16 }
   0x6   :  { %p680_p0 = scmp.ne.s32.totalorder %s29_s16, %s679_s17  ;;  %p685_p2 = scmp.lt.s32.totalorder %s679_s17, %s679_s17 }
   0x8   :  { %p686_p3 = por %p685_p2, %p684_p1 }
   0xa   :  { %p687_p4 = pnand %p686_p3, %p680_p0 }
   0xc   :  { %690 = shalt.err (!%p687_p4)
}
   0xd   :  { %s780_s18 = smov 32   ;;  %s781_s19 = smov 2  }
   0xe   :  { %34 = dma.hbm_to_vmem [thread:$0]  %s904_s1, 96, %s29_s16, [#allocation6], %s780_s18, %s780_s18, %s781_s19  }
   0xf   :  { %s782_s22 = smov [#allocation2]   ;;  %s783_s24 = smov [#allocation7]  }
  0x10   :  { %s19_s23 = sshll.u32 %s782_s22, 4  ;;  %s40_s25 = sshll.u32 %s783_s24, 4  ;;  %s20_s23 = int_to_ptr.vmem [resolvable:$true] %s19_s23  ;;  %s41_s25 = int_to_ptr.vmem [resolvable:$true] %s40_s25 }
  0x11   :  { %s699_s26 = scalar_lea.vmem %s20_s23, 32  ;;  %p704_p6 = scmp.lt.s32.totalorder %s20_s23, %s20_s23 }
  0x12   :  { %p700_p5 = scmp.ne.s32.totalorder %s20_s23, %s699_s26  ;;  %p705_p7 = scmp.lt.s32.totalorder %s699_s26, %s699_s26 }
  0x14   :  { %p706_p8 = por %p705_p7, %p704_p6 }
  0x16   :  { %p707_p9 = pnand %p706_p8, %p700_p5 }
  0x18   :  { %710 = shalt.err (!%p707_p9)
}
  0x19   :  { %22 = dma.hbm_to_vmem [thread:$0]  %s903_s0, 32, %s20_s23, [#allocation3]  }
  0x1a   :  { %s719_s29 = scalar_lea.vmem %s41_s25, 96  ;;  %p724_p11 = scmp.lt.s32.totalorder %s41_s25, %s41_s25 }
  0x1b   :  { %p720_p10 = scmp.ne.s32.totalorder %s41_s25, %s719_s29  ;;  %p725_p12 = scmp.lt.s32.totalorder %s719_s29, %s719_s29 }
  0x1d   :  { %p726_p13 = por %p725_p12, %p724_p11 }
  0x1f   :  { %p727_p0 = pnand %p726_p13, %p720_p10 }
  0x21   :  { %730 = shalt.err (!%p727_p0)
}
  0x22   :  { %46 = dma.hbm_to_vmem [thread:$0]  %s905_s2, 96, %s41_s25, [#allocation6], %s780_s18, %s780_s18, %s781_s19  }
  0x23   :  { %s784_s5 = smov [#allocation8]  }
  0x24   :  { %s52_s6 = sshll.u32 %s784_s5, 4  ;;  %s53_s6 = int_to_ptr.vmem [resolvable:$true] %s52_s6 }
  0x25   :  { %s739_s7 = scalar_lea.vmem %s53_s6, 512  ;;  %p744_p2 = scmp.lt.s32.totalorder %s53_s6, %s53_s6 }
  0x26   :  { %p740_p1 = scmp.ne.s32.totalorder %s53_s6, %s739_s7  ;;  %p745_p3 = scmp.lt.s32.totalorder %s739_s7, %s739_s7 }
  0x28   :  { %p746_p4 = por %p745_p3, %p744_p2 }
  0x2a   :  { %p747_p5 = pnand %p746_p4, %p740_p1 }
  0x2c   :  { %750 = shalt.err (!%p747_p5)
}
  0x2d   :  { %s785_s0 = smov 128   ;;  %s786_s8 = smov 8  }
  0x2e   :  { %58 = dma.hbm_to_vmem [thread:$0]  %s906_s3, 512, %s53_s6, [#allocation9], %s785_s0, %s785_s0, %s786_s8  }
  0x2f   :  { %771 = dma.done.wait [#allocation3], 32  }
  0x30   :  { %772 = vsyncadd [#allocation3], 4294967264 }
  0x31   :  { %773 = dma.done.wait [#allocation6], 192  }
  0x32   :  { %774 = vsyncadd [#allocation6], 4294967104 }
  0x33   :  { %775 = dma.done.wait [#allocation9], 512  }
  0x34   :  { %776 = vsyncadd [#allocation9], 4294966784  ;;  %v834_v0 = vld [vmem:[#allocation8 + $0x18] sm:$0xff]  ;;  %v836_v1 = vld [vmem:[#allocation8 + $0x10] sm:$0xff]  ;;  %vm97_vm0 = vcmask 1041408   ;;  %vm99_vm1 = vcmask 1043456   ;;  %v191_v21 = vlaneseq }
  0x35   :  { %609 = vmatprep.subr.mxu0 %v834_v0  ;;  %v839_v2 = vld [vmem:[#allocation2] sm:$0x3]  ;;  %v72_v3 = vld [vmem:[#allocation5] sm:$0x3]  ;;  %vm101_vm2 = vcmask 1045504   ;;  %v842_v4 = vld [vmem:[#allocation8 + $0x8] sm:$0xff] }
  0x36   :  { %610 = vmatpush3.msra.mxu0 %v834_v0  ;;  %v74_v5 = vld [vmem:[#allocation5 + $0x2] sm:$0x3]  ;;  %v76_v6 = vld [vmem:[#allocation5 + $0x4] sm:$0x3]  ;;  %v83_v7 = vrot.slane %v72_v3, 6  ;;  %v846_v12 = vld [vmem:[#allocation8] sm:$0xff] }
  0x37   :  { %611 = vmatprep.subr.mxu0 %v836_v1  ;;  %v86_v8 = vrot.slane %v74_v5, 4  ;;  %v89_v9 = vrot.slane %v76_v6, 2  ;;  %v77_v10 = vld [vmem:[#allocation7] sm:$0x3]  ;;  %v79_v11 = vld [vmem:[#allocation7 + $0x2] sm:$0x3] }
  0x38   :  { %612 = vmatpush3.msra.mxu0 %v836_v1  ;;  %v98_v13 = vsel %vm97_vm0, %v839_v2, %v83_v7  ;;  %vm109_vm3 = vcmask 261120   ;;  %v81_v14 = vld [vmem:[#allocation7 + $0x4] sm:$0x3]  ;;  %v92_v15 = vrot.slane %v79_v11, 6  ;;  %v860_v22 = vand.u32 127, %v191_v21  ;;  %s790_s2 = smov 96  }
  0x39   :  { %613 = vmatprep.subr.mxu0 %v842_v4  ;;  %v100_v16 = vsel %vm99_vm1, %v98_v13, %v86_v8  ;;  %v95_v17 = vrot.slane %v81_v14, 4  ;;  %v192_v23 = vshrl.u32 %v191_v21, 7  ;;  %v787_v28 = vmov 0.0   ;;  %s791_s3 = smov 64   ;;  %s792_s11 = smov [#allocation10]  }
  0x3a   :  { %614 = vmatpush3.msra.mxu0 %v842_v4  ;;  %v102_v18 = vsel %vm101_vm2, %v100_v16, %v89_v9  ;;  %v103_v19 = vsel %vm97_vm0, %v77_v10, %v92_v15  ;;  %v198_v24 = vmul.u32 8, %v860_v22  ;;  %620 = vmatprep.subr.mxu1 %v787_v28  ;;  %v788_v29 = vmov 1.0   ;;  %s565_s12 = sshll.u32 %s792_s11, 4  ;;  %s566_s12 = int_to_ptr.vmem [resolvable:$true] %s565_s12 }
  0x3b   :  { %615 = vmatprep.subr.mxu0 %v846_v12  ;;  %617 = vmatprep.mubr.msk.f32.mxu0 %vm109_vm3, %v102_v18  ;;  %v104_v20 = vsel %vm99_vm1, %v103_v19, %v95_v17  ;;  %v195_v25 = vadd.s32 24, %v192_v23  ;;  %v194_v27 = vadd.s32 16, %v192_v23  ;;  %v193_v30 = vadd.s32 8, %v192_v23  ;;  %s751_s13 = scalar_lea.vmem %s566_s12, 32  ;;  %p756_p7 = scmp.lt.s32.totalorder %s566_s12, %s566_s12 }
  0x3c   :  { %616 = vmatpush3.msra.mxu0 %v846_v12  ;;  %v203_v26 = vadd.s32 8, %v198_v24  ;;  %vm199_vm13 = vcmp.ge.s32.totalorder %v192_v23, %v198_v24  ;;  %vm789_vm2 = vmmov 0   ;;  %v356_v46 = vmul.u32 8, %v192_v23  ;;  %p752_p6 = scmp.ne.s32.totalorder %s566_s12, %s751_s13  ;;  %p757_p8 = scmp.lt.s32.totalorder %s751_s13, %s751_s13 }
  0x3d   :  { %618 = vmatmul.mubr.msk.f32.vlgmr.msra.gmra.mxu0 %vm109_vm3, %v104_v20  ;;  %vm202_vm4 = vcmp.ge.s32.totalorder %v195_v25, %v198_v24  ;;  %631 = vmatprep.subr.mxu0 %v787_v28  ;;  %vm201_vm7 = vcmp.ge.s32.totalorder %v194_v27, %v198_v24  ;;  %vm200_vm10 = vcmp.ge.s32.totalorder %v193_v30, %v198_v24 }
  0x3e   :  { %vm207_vm5 = vcmp.lt.s32.totalorder %v195_v25, %v203_v26  ;;  %vm206_vm8 = vcmp.lt.s32.totalorder %v194_v27, %v203_v26  ;;  %vm205_vm11 = vcmp.lt.s32.totalorder %v193_v30, %v203_v26  ;;  %vm204_vm14 = vcmp.lt.s32.totalorder %v192_v23, %v203_v26  ;;  %628 = vmatprep.mubr.msk.f32.mxu1 %vm789_vm2, %v787_v28  ;;  %p758_p9 = por %p757_p8, %p756_p7 }
  0x3f   :  { %vm211_vm6 = vmand %vm202_vm4, %vm207_vm5  ;;  %633 = vmatprep.mubr.msk.f32.mxu0 %vm789_vm2, %v787_v28  ;;  %vm357_vm4 = vcmp.ge.s32.totalorder %v860_v22, %v356_v46  ;;  %v358_v47 = vadd.s32 8, %v356_v46 }
  0x40   :  { %621 = vmatpush3.msk.msra.mxu1 %vm211_vm6, %v788_v29  ;;  %vm210_vm9 = vmand %vm201_vm7, %vm206_vm8  ;;  %vm365_vm7 = vcmask 31744   ;;  %p759_p10 = pnand %p758_p9, %p752_p6 }
  0x41   :  { %622 = vmatprep.subr.mxu1 %v787_v28  ;;  %vm209_vm12 = vmand %vm200_vm10, %vm205_vm11  ;;  %vm359_vm5 = vcmp.lt.s32.totalorder %v860_v22, %v358_v47 }
  0x42   :  { %623 = vmatpush3.msk.msra.mxu1 %vm210_vm9, %v788_v29  ;;  %vm208_vm15 = vmand %vm199_vm13, %vm204_vm14 }
  0x43   :  { %624 = vmatprep.subr.mxu1 %v787_v28  ;;  %vm360_vm6 = vmand %vm357_vm4, %vm359_vm5 }
  0x44   :  { %625 = vmatpush3.msk.msra.mxu1 %vm209_vm12, %v788_v29  ;;  %v587_v48 = vsel %vm360_vm6, 1.0, %v787_v28 }
  0x45   :  { %626 = vmatprep.subr.mxu1 %v787_v28  ;;  %632 = vmatpush3.msk.msra.mxu0 %vm99_vm1, %v587_v48 }
  0x46   :  { %627 = vmatpush3.msk.msra.mxu1 %vm208_vm15, %v788_v29 }
  0x47   :  { %636 = vmatprep.subr.mxu1 %v787_v28 }
  0xfd   :  { %v619_v31 = vpop.f32.mrf.mxu0 }
  0xff   :  { %v182_v32 = vpop.f32.mrf.mxu0 }
 0x100   :  { %v226_v33 = vrot.slane %v182_v32, 4  ;;  %v221_v34 = vrot.slane %v182_v32, 2  ;;  %v231_v35 = vrot.slane %v182_v32, 6 }
 0x102   :  { %227 = vrot.lane.b32.xlu0 %v226_v33, %s790_s2  ;;  %222 = vrot.lane.b32.xlu1 %v221_v34, %s790_s2 }
 0x106   :  { %232 = vrot.lane.b32.xlu0 %v231_v35, %s790_s2  ;;  %443 = vrot.lane.b32.xlu1 %v619_v31, %s791_s3 }
 0x10a   :  { %464 = vrot.lane.b32.xlu0 %v834_v0, %s780_s18  ;;  %462 = vrot.lane.b32.xlu1 %v836_v1, %s780_s18 }
 0x10e   :  { %460 = vrot.lane.b32.xlu0 %v842_v4, %s780_s18  ;;  %458 = vrot.lane.b32.xlu1 %v846_v12, %s780_s18 }
 0x174   :  { %v228_v36 = vpop.permute.xlu0 %227  ;;  %v223_v38 = vpop.permute.xlu1 %222 }
 0x175   :  { %v230_v37 = vmul.f32 %v228_v36, %v182_v32  ;;  %v225_v42 = vmul.f32 %v223_v38, %v182_v32 }
 0x177   :  { %v237_v39 = vrot.slane %v230_v37, 6 }
 0x178   :  { %v233_v40 = vpop.permute.xlu0 %232  ;;  %v444_v15 = vpop.permute.xlu1 %443 }
 0x179   :  { %v235_v41 = vmul.f32 %v233_v40, %v182_v32  ;;  %v242_v44 = vsel %vm97_vm0, %v225_v42, %v237_v39 }
 0x17b   :  { %v240_v43 = vrot.slane %v235_v41, 4 }
 0x17c   :  { %v465_v16 = vpop.permute.xlu0 %464  ;;  %v463_v17 = vpop.permute.xlu1 %462 }
 0x17d   :  { %v243_v45 = vsel %vm99_vm1, %v242_v44, %v240_v43 }
 0x17e   :  { %629 = vmatmul.mubr.msk.f32.vlgmr.msra.gmra.mxu1 %vm109_vm3, %v243_v45 }
 0x17f   :  { %644 = vmatprep.mubr.msk.f32.mxu1 %vm789_vm2, %v787_v28  ;;  %637 = vmatpush3.msra.mxu1 %v465_v16 }
 0x180   :  { %638 = vmatprep.subr.mxu1 %v787_v28  ;;  %v461_v18 = vpop.permute.xlu0 %460  ;;  %v459_v19 = vpop.permute.xlu1 %458 }
 0x181   :  { %639 = vmatpush3.msra.mxu1 %v463_v17 }
 0x182   :  { %640 = vmatprep.subr.mxu1 %v787_v28 }
 0x183   :  { %641 = vmatpush3.msra.mxu1 %v461_v18 }
 0x184   :  { %642 = vmatprep.subr.mxu1 %v787_v28 }
 0x185   :  { %643 = vmatpush3.msra.mxu1 %v459_v19 }
 0x23e   :  { %v313_v49 = vpop.f32.mrf.mxu1 }
 0x23f   :  { %v318_v50 = vrot.slane %v313_v49, 2  ;;  %v321_v53 = vrot.slane %v313_v49, 4 }
 0x240   :  { %v630_v51 = vpop.f32.mrf.mxu1 }
 0x241   :  { %v320_v52 = vmax.f32 %v313_v49, %v318_v50 }
 0x243   :  { %v323_v54 = vmax.f32 %v320_v52, %v321_v53 }
 0x245   :  { %v324_v55 = vsub.f32 %v313_v49, %v323_v54  ;;  %v328_v56 = vrot.slane %v323_v54, 6  ;;  %v333_v57 = vrot.slane %v323_v54, 4 }
 0x247   :  { %v330_v58 = vsub.f32 %v313_v49, %v328_v56  ;;  %v335_v59 = vsub.f32 %v313_v49, %v333_v57  ;;  %v325_v60 = vmul.f32 1.442695, %v324_v55 }
 0x249   :  { %v331_v61 = vmul.f32 1.442695, %v330_v58  ;;  %v336_v62 = vmul.f32 1.442695, %v335_v59 }
 0x24b   :  { %661 = vpow2.f32 %v331_v61 }
 0x24c   :  { %663 = vpow2.f32 %v336_v62 }
 0x24d   :  { %665 = vpow2.f32 %v325_v60 }
 0x258   :  { %v662_v63 = vpop.eup %661 }
 0x259   :  { %v664_v0 = vpop.eup %663  ;;  %v339_v1 = vrot.slane %v662_v63, 2 }
 0x25a   :  { %v666_v3 = vpop.eup %665  ;;  %v343_v5 = vrot.slane %v664_v0, 4 }
 0x25b   :  { %v341_v4 = vadd.f32 %v666_v3, %v339_v1 }
 0x25d   :  { %v345_v6 = vadd.f32 %v343_v5, %v341_v4 }
 0x25f   :  { %667 = vrcp.f32 %v345_v6 }
 0x26c   :  { %v668_v7 = vpop.eup %667 }
 0x26d   :  { %v350_v8 = vrot.slane %v668_v7, 6  ;;  %v353_v9 = vrot.slane %v668_v7, 4  ;;  %v348_v10 = vmul.f32 %v668_v7, %v666_v3 }
 0x26f   :  { %v352_v11 = vmul.f32 %v662_v63, %v350_v8  ;;  %v355_v12 = vmul.f32 %v664_v0, %v353_v9 }
 0x271   :  { %v363_v13 = vsel %vm97_vm0, %v348_v10, %v352_v11  ;;  %vm543_vm0 = vcmask 254976  }
 0x272   :  { %v364_v14 = vsel %vm99_vm1, %v363_v13, %v355_v12 }
 0x273   :  { %634 = vmatmul.mubr.msk.f32.vlgmr.msra.gmra.mxu0 %vm365_vm7, %v364_v14 }
 0x333   :  { %v438_v20 = vpop.f32.mrf.mxu0 }
 0x334   :  { %v446_v21 = vmul.f32 %v444_v15, %v438_v20 }
 0x335   :  { %v635_v22 = vpop.f32.mrf.mxu0 }
 0x336   :  { %v448_v23 = vrot.slane %v446_v21, 2  ;;  %v451_v25 = vrot.slane %v446_v21, 4 }
 0x338   :  { %v450_v24 = vadd.f32 %v448_v23, %v446_v21 }
 0x33a   :  { %v453_v26 = vadd.f32 %v451_v25, %v450_v24 }
 0x33c   :  { %645 = vmatmul.mubr.msk.f32.vlgmr.msra.gmra.mxu1 %vm109_vm3, %v453_v26 }
 0x3fc   :  { %v539_v27 = vpop.f32.mrf.mxu1 }
 0x3fd   :  { %v540_v29 = vadd.f32 %v539_v27, %v839_v2 }
 0x3fe   :  { %v646_v30 = vpop.f32.mrf.mxu1 }
 0x3ff   :  { %v544_v31 = vsel %vm543_vm0, %v540_v29, 0.0 }
 0x400   :  { %545 = vadd.xlane.f32.xlu0 %v544_v31 }
 0x489   :  { %v546_v28 = vpop.xlane.xlu0 %545 }
 0x48a   :  { %v548_v32 = vmul.f32 0.03125, %v546_v28 }
 0x48c   :  { %v549_v33 = vsub.f32 %v540_v29, %v548_v32 }
 0x48e   :  { %v550_v34 = vmul.f32 %v549_v33, %v549_v33 }
 0x490   :  { %v551_v35 = vsel %vm543_vm0, %v550_v34, 0.0 }
 0x491   :  { %552 = vadd.xlane.f32.xlu1 %v551_v35 }
 0x51a   :  { %v553_v36 = vpop.xlane.xlu1 %552 }
 0x51b   :  { %v554_v37 = vmul.f32 0.03125, %v553_v36 }
 0x51d   :  { %v555_v38 = vadd.f32 1e-05, %v554_v37 }
 0x51f   :  { %669 = vrsqrt.f32 %v555_v38 }
 0x52c   :  { %v670_v39 = vpop.eup %669 }
 0x52d   :  { %v557_v40 = vmul.f32 %v670_v39, %v549_v33 }
 0x52f   :  { %558 = vst.msk [vmem:[#allocation10] sm:$0x3] %vm543_vm0, %v557_v40 }
 0x530   :  { %762 = shalt.err (!%p759_p10)
}
 0x531   :  { %568 = dma.vmem_to_hbm [thread:$0]  %s566_s12, 32, %s907_s4, [#allocation4]  }
 0x532   :  { %777 = dma.done.wait [#allocation4], 32  }
 0x533   :  { %778 = vsyncadd [#allocation4], 4294967264 }
 0x534   :  { %572 = vsyncpa [#allocation3], 1 }
 0x535   :  { %573 = vsyncpa [#allocation6], 1 }
 0x536   :  { %574 = vsyncpa [#allocation9], 1 }
 0x537   :  { %575 = vsyncpa [#allocation4], 1 }

</bundles_post_ra>
